<compile_context>
chip_gen: v5e
topology: v5e:2x2
jax: 0.10.0
libtpu: 0.0.40
codegen_flags: <defaults>
</compile_context>

<pallas_src>
import functools

import jax
import jax.numpy as jnp
from jax import lax
from jax.experimental import pallas as pl
from jax.experimental.pallas import tpu as pltpu


# Safe on all generations (v7x per-TC physical VMEM is 64 MiB).
_VMEM_LIMIT_BYTES = 48 * 1024 * 1024


def _round_up(x, m):
    return (x + m - 1) // m * m


def _choose_batch_block(N, per_image_io_bytes, resident_bytes, vmem_budget_bytes):
    """Images per grid step.

    Budget: ~2x per-image I/O for double buffering + ~1x again for in-kernel
    f32 temporaries, resident weights double-buffered, hard cap of 32 so the
    unrolled per-image epilogue stays small.  When N >= 2 keep the grid length
    >= 2 so v7x's second TensorCore gets work under "parallel" semantics.
    """
    usable = max(vmem_budget_bytes - 4 * resident_bytes, 3 * per_image_io_bytes)
    b = max(1, usable // (3 * per_image_io_bytes))
    b = int(min(b, 32, N))
    if N >= 2:
        b = min(b, -(-N // 2))          # ceil(N/2) -> grid >= 2
    return max(1, b)


def _max_att_kernel(x_ref, w_ref, bpos_ref, feat_ref, pack_ref, *,
                    HW, C_att, C_att_pad, HW_pad, PACK):
    """Per-grid-step body over a block of B_blk images.

    x_ref    : (B_blk, HW, C_bb)          bf16  backbone features (NHWC-flat)
    w_ref    : (C_bb, 3*C_att)            bf16  W_reduce @ [Wq | Wk | Wv]
    bpos_ref : (HW, 3*C_att)              f32   loc_enc @ [Wq|Wk|Wv] + [bq|bk|bv]
    feat_ref : (B_blk, C_att_pad, HW_pad) f32   post-attention features (lane dense)
    pack_ref : (B_blk, C_att_pad, PACK)   f32   [score | argmax idx | m_features | 0..]
    """
    B_blk = x_ref.shape[0]
    C_bb = x_ref.shape[2]
    C3 = 3 * C_att
    f32 = jnp.float32

    # --- ONE fused reduce + loc-encoding + Q/K/V matmul for the whole block ----
    # M = B_blk * HW amortizes per-step overhead and feeds the MXU a larger M.
    x2d = x_ref[...].reshape(B_blk * HW, C_bb)                      # free dim merge
    qkv2d = jnp.dot(x2d, w_ref[...], preferred_element_type=f32)   # (B_blk*HW, 3*C_att)
    bpos = bpos_ref[...]                                            # (HW, 3*C_att)

    # --- tiny per-image attention + max/gather epilogue (fully unrolled) -------
    for b in range(B_blk):
        qkv = qkv2d[b * HW:(b + 1) * HW, :] + bpos                  # (HW, 3*C_att)
        q = qkv[:, 0:C_att]
        k = qkv[:, C_att:2 * C_att]
        v = qkv[:, 2 * C_att:C3]

        # att = softmax(Q^T K, axis=-1)   (C_att, C_att)
        logits = lax.dot_general(q, k, (((0,), (0,)), ((), ())),
                                 preferred_element_type=f32)
        logits = logits - jnp.max(logits, axis=1, keepdims=True)
        e = jnp.exp(logits)
        att = e * pl.reciprocal(jnp.sum(e, axis=1, keepdims=True), approx=True)

        # att_features = att @ V^T  ->  (C_att, HW)
        att_feat = lax.dot_general(att, v, (((1,), (1,)), ((), ())),
                                   preferred_element_type=f32)

        # spatial max / first-argmax over the HW valid positions
        p_col = lax.broadcasted_iota(jnp.int32, att_feat.shape, 1)  # (C_att, HW)
        m = jnp.max(att_feat, axis=1, keepdims=True)                # (C_att, 1)
        idx = jnp.min(jnp.where(att_feat == m, p_col, HW),
                      axis=1, keepdims=True)                        # (C_att, 1) int32

        # gather all channels at each channel's max location (one-hot matmul,
        # kept f32 -> exact gather): mfeat[c, kk] = att_feat[c, idx[kk]]
        onehot = (p_col == idx).astype(f32)                         # (C_att, HW)
        mfeat = lax.dot_general(att_feat, onehot, (((1,), (1,)), ((), ())),
                                preferred_element_type=f32)         # (C_att, C_att)

        # --- assemble in registers; single unmasked full-tile store each -------
        parts = [m, idx.astype(f32), mfeat]
        if PACK > 2 + C_att:
            parts.append(jnp.zeros((C_att, PACK - 2 - C_att), f32))
        packed = jnp.concatenate(parts, axis=1)                     # (C_att, PACK)

        feat = att_feat
        if HW_pad > HW:
            feat = jnp.concatenate(
                [feat, jnp.zeros((C_att, HW_pad - HW), f32)], axis=1)
        if C_att_pad > C_att:
            feat = jnp.concatenate(
                [feat, jnp.zeros((C_att_pad - C_att, HW_pad), f32)], axis=0)
            packed = jnp.concatenate(
                [packed, jnp.zeros((C_att_pad - C_att, PACK), f32)], axis=0)

        feat_ref[b] = feat                                          # (C_att_pad, HW_pad)
        pack_ref[b] = packed                                        # (C_att_pad, PACK)


def max_att_net_forward(features_nchw, params):
    N, C_bb, H, W = features_nchw.shape
    HW = H * W
    C_att = params["wq"].shape[1]
    C3 = 3 * C_att
    HW_pad = _round_up(HW, 128)            # lane-dense feature output
    PACK = _round_up(2 + C_att, 128)       # lane-dense packed side output
    C_att_pad = _round_up(C_att, 8)        # sublane-dense output stores
    hp = jax.lax.Precision.HIGHEST         # one-time f32 precompute, keep exact

    # --- fold reduce (1x1 conv) + location encoder into the QKV projection -----
    w_qkv = jnp.concatenate([params["wq"], params["wk"], params["wv"]], axis=1)
    b_qkv = jnp.concatenate([params["bq"], params["bk"], params["bv"]], axis=1)
    w_comb = jnp.dot(params["w_reduce"], w_qkv, precision=hp).astype(jnp.bfloat16)

    r = jnp.arange(HW, dtype=jnp.int32)
    li = (r // W).astype(jnp.float32)[:, None]                      # row index
    lj = (r % W).astype(jnp.float32)[:, None]                       # col index
    loc_tab = li * params["w_loc"][0:1] + lj * params["w_loc"][1:2] + params["b_loc"]
    b_pos = jnp.dot(loc_tab, w_qkv, precision=hp) + b_qkv           # (HW, 3*C_att) f32

    # --- NCHW -> (N, HW, C_bb): cast to bf16 FIRST (halves relayout bytes); the
    #     spatial axis is NOT padded (it stays the full, untiled dim).
    x = features_nchw.astype(jnp.bfloat16)
    x = jnp.transpose(x, (0, 2, 3, 1)).reshape(N, HW, C_bb)

    # --- pick images-per-step from the VMEM budget ------------------------------
    per_image_io = HW * C_bb * 2 + C_att_pad * (HW_pad + PACK) * 4
    resident = C_bb * C3 * 2 + HW * C3 * 4
    B_blk = _choose_batch_block(N, per_image_io, resident, _VMEM_LIMIT_BYTES)
    n_steps = -(-N // B_blk)
    N_pad = n_steps * B_blk
    if N_pad > N:
        x = jnp.pad(x, ((0, N_pad - N), (0, 0), (0, 0)))

    kernel = functools.partial(_max_att_kernel, HW=HW, C_att=C_att,
                               C_att_pad=C_att_pad, HW_pad=HW_pad, PACK=PACK)
    full2d = lambda n: (0, 0)

    feat_o, pack_o = pl.pallas_call(
        kernel,
        out_shape=(
            jax.ShapeDtypeStruct((N_pad, C_att_pad, HW_pad), jnp.float32),
            jax.ShapeDtypeStruct((N_pad, C_att_pad, PACK), jnp.float32),
        ),
        grid_spec=pltpu.PrefetchScalarGridSpec(
            num_scalar_prefetch=0,
            grid=(n_steps,),
            in_specs=[
                pl.BlockSpec((B_blk, HW, C_bb), lambda n: (n, 0, 0)),
                pl.BlockSpec((C_bb, C3), full2d),      # VMEM-resident fused weight
                pl.BlockSpec((HW, C3), full2d),        # VMEM-resident positional bias
            ],
            out_specs=[
                pl.BlockSpec((B_blk, C_att_pad, HW_pad), lambda n: (n, 0, 0)),
                pl.BlockSpec((B_blk, C_att_pad, PACK), lambda n: (n, 0, 0)),
            ],
        ),
        compiler_params=pltpu.CompilerParams(
            dimension_semantics=("parallel",),         # batch-block axis -> 2 TCs on v7x
            vmem_limit_bytes=_VMEM_LIMIT_BYTES),
    )(x, w_comb, b_pos)

    scores = pack_o[:N, :C_att, 0]                                  # (N, C_att)
    indices = pack_o[:N, :C_att, 1].astype(jnp.int32)               # (N, C_att)
    m_features = pack_o[:N, :C_att, 2:2 + C_att]                    # (N, C_att, C_att)
    # torch: cat(indices / W, indices % W) -> TRUE division (float row coord)
    locations = jnp.stack(
        [indices.astype(jnp.float32) / W, (indices % W).astype(jnp.float32)],
        axis=2)                                                     # (N, C_att, 2)
    features = feat_o[:N, :C_att, :HW].reshape(N, C_att, H, W)      # NCHW
    return scores, locations, m_features, features


def init_params(keys, C_bb, C_red, C_att):
    # Modest scales (the torch module has no 1/sqrt(d) attention scaling), so
    # the bf16-vs-f32 correctness check below stays meaningful.
    s = lambda fan_in: 1.0 / jnp.sqrt(jnp.float32(fan_in))
    return {
        # 1x1 conv weight (C_red, C_bb, 1, 1) stored transposed as (C_bb, C_red)
        "w_reduce": jax.random.normal(keys[0], (C_bb, C_red), jnp.float32) * s(C_bb),
        # location encoder Linear(2 -> C_red), stored as W^T (2, C_red)
        "w_loc": jax.random.normal(keys[1], (2, C_red), jnp.float32) * 0.1,
        "b_loc": jax.random.normal(keys[2], (1, C_red), jnp.float32) * 0.05,
        # attention Linear(C_red -> C_att), stored as W^T
        "wq": jax.random.normal(keys[3], (C_red, C_att), jnp.float32) * 0.5 * s(C_red),
        "bq": jax.random.normal(keys[4], (1, C_att), jnp.float32) * 0.05,
        "wk": jax.random.normal(keys[5], (C_red, C_att), jnp.float32) * 0.5 * s(C_red),
        "bk": jax.random.normal(keys[6], (1, C_att), jnp.float32) * 0.05,
        "wv": jax.random.normal(keys[7], (C_red, C_att), jnp.float32) * 0.5 * s(C_red),
        "bv": jax.random.normal(keys[8], (1, C_att), jnp.float32) * 0.05,
    }


def _reference(x_nchw, p):
    """Plain-JAX f32 reference of the same forward (matches the torch math)."""
    hp = jax.lax.Precision.HIGHEST
    N, C_bb, H, W = x_nchw.shape
    HW = H * W
    xf = jnp.transpose(x_nchw, (0, 2, 3, 1)).reshape(N, HW, C_bb)
    feat = jnp.dot(xf, p["w_reduce"], precision=hp)
    r = jnp.arange(HW)
    li = (r // W).astype(jnp.float32)[:, None]
    lj = (r % W).astype(jnp.float32)[:, None]
    feat = feat + (li * p["w_loc"][0:1] + lj * p["w_loc"][1:2] + p["b_loc"])[None]
    q = jnp.dot(feat, p["wq"], precision=hp) + p["bq"]
    k = jnp.dot(feat, p["wk"], precision=hp) + p["bk"]
    v = jnp.dot(feat, p["wv"], precision=hp) + p["bv"]
    att = jax.nn.softmax(jnp.einsum("npa,npb->nab", q, k, precision=hp), axis=2)
    att_feat = jnp.einsum("nab,npb->nap", att, v, precision=hp)     # (N, C_att, HW)
    scores = att_feat.max(axis=2)
    return scores, att_feat.reshape(N, -1, H, W)


if __name__ == "__main__":
    N, C_bb, H, W = 2, 128, 8, 8
    C_red, C_att = C_bb // 4, C_bb // 32                # 32, 4
    HW = H * W

    key = jax.random.PRNGKey(0)
    kx, *kp = jax.random.split(key, 11)
    # TODO(synk): ResNet34 backbone omitted; start from the backbone feature map.
    features_bb = jax.random.normal(kx, (N, C_bb, H, W), jnp.float32)
    params = init_params(kp, C_bb, C_red, C_att)

    out = max_att_net_forward(features_bb, params)
    scores, locations, m_features, features = jax.block_until_ready(out)

    assert scores.shape == (N, C_att) and locations.shape == (N, C_att, 2)
    assert m_features.shape == (N, C_att, C_att) and features.shape == (N, C_att, H, W)

    # (a) heavy path vs full-f32 reference. The kernel uses bf16 MXU operands
    #     and an approximate reciprocal, so tolerance is bf16-level, not f32.
    ref_scores, ref_feat = _reference(features_bb, params)
    assert jnp.allclose(features, ref_feat, rtol=1e-1, atol=5e-2)
    assert jnp.allclose(scores, ref_scores, rtol=1e-1, atol=5e-2)

    # (b) max / argmax / gather epilogue vs XLA ops on the kernel's OWN feature
    #     map. (Index-derived outputs are not compared to the f32 reference
    #     because near-ties could legally flip the argmax under bf16.)
    feat_flat = features.reshape(N, C_att, HW)
    idx_chk = jnp.argmax(feat_flat, axis=2)             # first max = kernel tie-break
    assert jnp.allclose(scores, jnp.max(feat_flat, axis=2), atol=1e-5)
    assert jnp.allclose(
        m_features,
        jnp.take_along_axis(feat_flat, idx_chk[:, None, :], axis=2),
        rtol=1e-2, atol=1e-2)
    loc_chk = jnp.stack(
        [idx_chk.astype(jnp.float32) / W, (idx_chk % W).astype(jnp.float32)], axis=2)
    assert jnp.allclose(locations, loc_chk, atol=1e-5)

    print("KERNEL_OK")
</pallas_src>

<mosaic_0001>
module attributes {stable_mosaic.version = 11 : i64} {
  func.func @_max_att_kernel(%arg0: i32, %arg1: memref<1x64x128xbf16, #tpu.memory_space<vmem>>, %arg2: memref<128x12xbf16, #tpu.memory_space<vmem>>, %arg3: memref<64x12xf32, #tpu.memory_space<vmem>>, %arg4: memref<1x8x128xf32, #tpu.memory_space<vmem>>, %arg5: memref<1x8x128xf32, #tpu.memory_space<vmem>>) attributes {dimension_semantics = [#tpu.dimension_semantics<parallel>], iteration_bounds = array<i64: 2>, scalar_prefetch = 0 : i64, scratch_operands = 0 : i64, tpu.core_type = #tpu.core_type<tc>, window_params = [{transform_indices = @transform_0, window_bounds = array<i64: 1, 64, 128>}, {pipeline_mode = #tpu.pipeline_mode<synchronous>, transform_indices = @transform_1, window_bounds = array<i64: 128, 12>}, {pipeline_mode = #tpu.pipeline_mode<synchronous>, transform_indices = @transform_2, window_bounds = array<i64: 64, 12>}, {transform_indices = @transform_3, window_bounds = array<i64: 1, 8, 128>}, {transform_indices = @transform_4, window_bounds = array<i64: 1, 8, 128>}]} {
    %c0 = arith.constant 0 : index
    %c0_0 = arith.constant 0 : index
    %c0_1 = arith.constant 0 : index
    %0 = vector.load %arg1[%c0, %c0_0, %c0_1] : memref<1x64x128xbf16, #tpu.memory_space<vmem>>, vector<1x64x128xbf16>
    %1 = vector.shape_cast %0 : vector<1x64x128xbf16> to vector<64x128xbf16>
    %c0_2 = arith.constant 0 : index
    %c0_3 = arith.constant 0 : index
    %2 = vector.load %arg2[%c0_2, %c0_3] : memref<128x12xbf16, #tpu.memory_space<vmem>>, vector<128x12xbf16>
    %cst = arith.constant dense<0.000000e+00> : vector<64x12xf32>
    %3 = tpu.matmul %1, %2, %cst {dimension_numbers = #tpu.dot_dimension_numbers<[1], [0], [0], [1], [0, 0, 1, 1], [], []>} : vector<64x128xbf16>, vector<128x12xbf16>, vector<64x12xf32> -> vector<64x12xf32>
    %c0_4 = arith.constant 0 : index
    %c0_5 = arith.constant 0 : index
    %4 = vector.load %arg3[%c0_4, %c0_5] : memref<64x12xf32, #tpu.memory_space<vmem>>, vector<64x12xf32>
    %5 = arith.addf %3, %4 : vector<64x12xf32>
    %6 = vector.extract_strided_slice %5 {offsets = [0, 0], sizes = [64, 4], strides = [1, 1]} : vector<64x12xf32> to vector<64x4xf32>
    %7 = vector.extract_strided_slice %5 {offsets = [0, 4], sizes = [64, 4], strides = [1, 1]} : vector<64x12xf32> to vector<64x4xf32>
    %8 = vector.extract_strided_slice %5 {offsets = [0, 8], sizes = [64, 4], strides = [1, 1]} : vector<64x12xf32> to vector<64x4xf32>
    %cst_6 = arith.constant dense<0.000000e+00> : vector<4x4xf32>
    %9 = tpu.matmul %6, %7, %cst_6 {dimension_numbers = #tpu.dot_dimension_numbers<[0], [0], [1], [1], [0, 1, 1, 1], [], []>} : vector<64x4xf32>, vector<64x4xf32>, vector<4x4xf32> -> vector<4x4xf32>
    %cst_7 = arith.constant dense<0xFF800000> : vector<4xf32>
    %10 = vector.multi_reduction <maximumf>, %9, %cst_7 [1] : vector<4x4xf32> to vector<4xf32>
    %11 = vector.shape_cast %10 : vector<4xf32> to vector<4x1xf32>
    %12 = vector.broadcast %11 : vector<4x1xf32> to vector<4x4xf32>
    %13 = arith.subf %9, %12 : vector<4x4xf32>
    %14 = math.exp %13 : vector<4x4xf32>
    %cst_8 = arith.constant dense<0.000000e+00> : vector<4xf32>
    %15 = vector.multi_reduction <add>, %14, %cst_8 [1] : vector<4x4xf32> to vector<4xf32>
    %16 = vector.shape_cast %15 : vector<4xf32> to vector<4x1xf32>
    %17 = tpu.reciprocal %16 {approx = true} : vector<4x1xf32> -> vector<4x1xf32>
    %18 = vector.broadcast %17 : vector<4x1xf32> to vector<4x4xf32>
    %19 = arith.mulf %14, %18 : vector<4x4xf32>
    %cst_9 = arith.constant dense<0.000000e+00> : vector<4x64xf32>
    %20 = tpu.matmul %19, %8, %cst_9 {dimension_numbers = #tpu.dot_dimension_numbers<[1], [1], [0], [0], [0, 0, 1, 0], [], []>} : vector<4x4xf32>, vector<64x4xf32>, vector<4x64xf32> -> vector<4x64xf32>
    %21 = tpu.iota {dimensions = array<i32: 1>} : vector<4x64xi32>
    %cst_10 = arith.constant dense<0xFF800000> : vector<4xf32>
    %22 = vector.multi_reduction <maximumf>, %20, %cst_10 [1] : vector<4x64xf32> to vector<4xf32>
    %23 = vector.shape_cast %22 : vector<4xf32> to vector<4x1xf32>
    %24 = vector.broadcast %23 : vector<4x1xf32> to vector<4x64xf32>
    %25 = arith.cmpf oeq, %20, %24 : vector<4x64xf32>
    %c64_i32 = arith.constant 64 : i32
    %26 = vector.broadcast %c64_i32 : i32 to vector<4x64xi32>
    %27 = arith.select %25, %21, %26 : vector<4x64xi1>, vector<4x64xi32>
    %cst_11 = arith.constant dense<2147483647> : vector<4xi32>
    %28 = vector.multi_reduction <minsi>, %27, %cst_11 [1] : vector<4x64xi32> to vector<4xi32>
    %29 = vector.shape_cast %28 : vector<4xi32> to vector<4x1xi32>
    %30 = vector.broadcast %29 : vector<4x1xi32> to vector<4x64xi32>
    %31 = arith.cmpi eq, %21, %30 : vector<4x64xi32>
    %32 = arith.extui %31 : vector<4x64xi1> to vector<4x64xi32>
    %33 = arith.sitofp %32 : vector<4x64xi32> to vector<4x64xf32>
    %cst_12 = arith.constant dense<0.000000e+00> : vector<4x4xf32>
    %34 = tpu.matmul %20, %33, %cst_12 {dimension_numbers = #tpu.dot_dimension_numbers<[1], [1], [0], [0], [0, 0, 1, 0], [], []>} : vector<4x64xf32>, vector<4x64xf32>, vector<4x4xf32> -> vector<4x4xf32>
    %35 = arith.sitofp %29 : vector<4x1xi32> to vector<4x1xf32>
    %cst_13 = arith.constant 0.000000e+00 : f32
    %36 = vector.broadcast %cst_13 : f32 to vector<4x122xf32>
    %37 = tpu.concatenate %23, %35, %34, %36 in 1 : vector<4x1xf32>, vector<4x1xf32>, vector<4x4xf32>, vector<4x122xf32> -> vector<4x128xf32>
    %cst_14 = arith.constant 0.000000e+00 : f32
    %38 = vector.broadcast %cst_14 : f32 to vector<4x64xf32>
    %39 = tpu.concatenate %20, %38 in 1 : vector<4x64xf32>, vector<4x64xf32> -> vector<4x128xf32>
    %cst_15 = arith.constant 0.000000e+00 : f32
    %40 = vector.broadcast %cst_15 : f32 to vector<4x128xf32>
    %41 = tpu.concatenate %39, %40 in 0 : vector<4x128xf32>, vector<4x128xf32> -> vector<8x128xf32>
    %cst_16 = arith.constant 0.000000e+00 : f32
    %42 = vector.broadcast %cst_16 : f32 to vector<4x128xf32>
    %43 = tpu.concatenate %37, %42 in 0 : vector<4x128xf32>, vector<4x128xf32> -> vector<8x128xf32>
    %c0_17 = arith.constant 0 : index
    %c0_18 = arith.constant 0 : index
    %c0_19 = arith.constant 0 : index
    %44 = vector.load %arg4[%c0_17, %c0_18, %c0_19] : memref<1x8x128xf32, #tpu.memory_space<vmem>>, vector<1x8x128xf32>
    %45 = vector.shape_cast %44 : vector<1x8x128xf32> to vector<8x128xf32>
    %46 = vector.shape_cast %41 : vector<8x128xf32> to vector<1x8x128xf32>
    tpu.vector_store %arg4[%c0_17, %c0_18, %c0_19], %46 {strides = array<i32>} : memref<1x8x128xf32, #tpu.memory_space<vmem>>, vector<1x8x128xf32>,
    %c0_20 = arith.constant 0 : index
    %c0_21 = arith.constant 0 : index
    %c0_22 = arith.constant 0 : index
    %47 = vector.load %arg5[%c0_20, %c0_21, %c0_22] : memref<1x8x128xf32, #tpu.memory_space<vmem>>, vector<1x8x128xf32>
    %48 = vector.shape_cast %47 : vector<1x8x128xf32> to vector<8x128xf32>
    %49 = vector.shape_cast %43 : vector<8x128xf32> to vector<1x8x128xf32>
    tpu.vector_store %arg5[%c0_20, %c0_21, %c0_22], %49 {strides = array<i32>} : memref<1x8x128xf32, #tpu.memory_space<vmem>>, vector<1x8x128xf32>,
    return
  }
  func.func @transform_0(%arg0: i32) -> (i32, i32, i32) {
    %c0_i32 = arith.constant 0 : i32
    %c0_i32_0 = arith.constant 0 : i32
    %c0_i32_1 = arith.constant 0 : i32
    return %arg0, %c0_i32, %c0_i32_0 : i32, i32, i32
  }
  func.func @transform_1(%arg0: i32) -> (i32, i32) {
    %c0_i32 = arith.constant 0 : i32
    %c0_i32_0 = arith.constant 0 : i32
    %c0_i32_1 = arith.constant 0 : i32
    return %c0_i32, %c0_i32_0 : i32, i32
  }
  func.func @transform_2(%arg0: i32) -> (i32, i32) {
    %c0_i32 = arith.constant 0 : i32
    %c0_i32_0 = arith.constant 0 : i32
    %c0_i32_1 = arith.constant 0 : i32
    return %c0_i32, %c0_i32_0 : i32, i32
  }
  func.func @transform_3(%arg0: i32) -> (i32, i32, i32) {
    %c0_i32 = arith.constant 0 : i32
    %c0_i32_0 = arith.constant 0 : i32
    %c0_i32_1 = arith.constant 0 : i32
    return %arg0, %c0_i32, %c0_i32_0 : i32, i32, i32
  }
  func.func @transform_4(%arg0: i32) -> (i32, i32, i32) {
    %c0_i32 = arith.constant 0 : i32
    %c0_i32_0 = arith.constant 0 : i32
    %c0_i32_1 = arith.constant 0 : i32
    return %arg0, %c0_i32, %c0_i32_0 : i32, i32, i32
  }
}

</mosaic_0001>

<bundles_post_ra>
// kernel: tpu_custom_call.1
= control target key start
LH: loop header
LB: loop body
LE: loop exit
PB: predicated region body
PF: predicated region fallthrough
CT: control target
= control target key end

     0   :  { %10 = vsyncpa [#allocation3], 0  ;;  %s1180_s0 = inlined_call_operand.vmem [shape: bf16[2,64,128], index: 0, kind: input, shape index: {}]   ;;  %s1181_s1 = inlined_call_operand.vmem [shape: bf16[128,12], index: 1, kind: input, shape index: {}]   ;;  %s1182_s2 = inlined_call_operand.vmem [shape: f32[64,12], index: 2, kind: input, shape index: {}]   ;;  %s1183_s3 = inlined_call_operand.hbm [shape: f32[2,8,128], index: 3, kind: output, shape index: {0}]   ;;  %s1184_s4 = inlined_call_operand.hbm [shape: f32[2,8,128], index: 4, kind: output, shape index: {1}]  }
   0x1   :  { %12 = vsyncpa [#allocation3 + $0x1], 0 }
   0x2   :  { %13 = vsyncpa [#allocation5], 0 }
   0x3   :  { %15 = vsyncpa [#allocation5 + $0x1], 0  ;;  %s993_s15 = smov 0   ;;  %s995_s16 = smov 0  }
   0x4   :  { %s997_s17 = smov 0   ;;  %s999_s18 = smov 0  }
   0x5 LB: > { %s1014_s19 = sadd.s32 4294967295, %s962_s18   ;;  %s692_s20 = sadd.s32 4294967294, %s962_s18   ;;  %s962_s18 = sphi %s999_s18, %s1190_s18   ;;  %s958_s17 = sphi %s997_s17, %s1189_s17   ;;  %s954_s16 = sphi %s995_s16, %s1188_s16   ;;  %s950_s15 = sphi %s993_s15, %s1187_s15  }
   0x6   : > { %s1018_s21 = sadd.s32 1, %s962_s18   ;;  %s96_s22 = sadd.s32 1, %s958_s17 }
   0x7   : > { %s93_s23 = ssub.s32 %s962_s18, %s1018_s21  ;;  %p106_p0 = scmp.ne.s32.totalorder %s958_s17, %s954_s16 }
   0x8   : > { %p94_p1 = scmp.eq.s32.totalorder %s93_s23, 0  ;;  %p107_p2 = scmp.eq.s32.totalorder %s1014_s19, 1 }
   0x9   : > { %p112_p3 = scmp.ne.s32.totalorder %s954_s16, %s950_s15  ;;  %p113_p4 = scmp.eq.s32.totalorder %s692_s20, 1 }
   0xa   : > { %s1029_s24 = scalar_select %p94_p1, %s958_s17, %s96_s22  }
   0xb   : > { %p1031_p5 = por %p107_p2, %p106_p0  ;;  %p1035_p6 = por %p113_p4, %p112_p3 }
   0xc   : > { %p695_p7 = scmp.ge.s32.totalorder %s962_s18, 1  ;;  %p171_p8 = scmp.lt.s32.totalorder %s962_s18, 3 }
   0xe   : > { %p172_p9 = pnand %p695_p7, %p171_p8 }
   0xf   : > { %p202_p10 = scmp.lt.s32.totalorder (!%p172_p9), %s1014_s19, 1  ;;  %s964_s28 = smov (!%p172_p9), 124  }
  0x10   : > { %175 = sbr.rel (%p172_p9) target bundleno = 1467 (0x5bb), region = 32  ;;  %s965_s5 = smov (!%p172_p9), 120  }
  0x11   : > { %s1118_s6 = sand.u32 (!%p172_p9), 1, %s954_s16   ;;  %s763_s9 = sshll.u32 (!%p172_p9), %s1014_s19, 3 }
  0x12   : > { %s696_s7 = sshll.u32 (!%p172_p9), %s1118_s6, 3  ;;  %s581_s12 = scalar_lea.hbm (!%p172_p9), %s1183_s3, %s763_s9 }
  0x13   : > { %s1125_s8 = scalar_lea.vmem (!%p172_p9), [#allocation2], %s696_s7  ;;  %s585_s14 = sshll.u32 (!%p172_p9), %s581_s12, 4  ;;  %s586_s14 = int_to_ptr.hbm [resolvable:$true] %s585_s14 }
  0x14   : > { %s566_s20 = scalar_lea.sflag (!%p172_p9), [#allocation3], %s1118_s6 }
  0x15   : > { %v779_v0 = vld [vmem:[%s1181_s1 + $0x38] sm:$0xff]  ;;  %v778_v1 = vld [vmem:[%s1181_s1 + $0x30] sm:$0xff]  ;;  %v777_v2 = vld [vmem:[%s1181_s1 + $0x28] sm:$0xff]  ;;  %s203_s13 = scalar_select %p202_p10, %s1014_s19, 1  ;;  %vm404_vm0 = vcmask 523264   ;;  %vm456_vm1 = vcmask 31744  }
  0x16   : > { %311 = vmatpush.bf16.msra.mxu0 %v779_v0  ;;  %781 = vmatpush.bf16.msra.mxu3 %v779_v0  ;;  %v776_v3 = vld [vmem:[%s1181_s1 + $0x20] sm:$0xff]  ;;  %v775_v4 = vld [vmem:[%s1181_s1 + $0x18] sm:$0xff]  ;;  %v774_v5 = vld [vmem:[%s1181_s1 + $0x10] sm:$0xff]  ;;  %vm428_vm2 = vcmask 27648   ;;  %vm498_vm3 = vcmask 519168   ;;  %vm560_vm4 = vcmask 1043456  }
  0x17   : > { %780 = vmatpush.bf16.msra.mxu1 %v779_v0  ;;  %v773_v6 = vld [vmem:[%s1181_s1 + $0x8] sm:$0xff]  ;;  %s767_s22 = sshll.u32 %s203_s13, 5  ;;  %v772_v7 = vld [vmem:[%s1181_s1] sm:$0xff]  ;;  %v237_v20 = vld [vmem:[%s1182_s2 + $0x30] sm:$0xff]  ;;  %s583_s13 = sshll.u32 %s1125_s8, 4  ;;  %s584_s13 = int_to_ptr.vmem [resolvable:$true] %s583_s13 }
  0x18   : > { %s206_s30 = scalar_lea.vmem %s1180_s0, %s767_s22  ;;  %v231_v12 = vld [vmem:[%s1182_s2] sm:$0xff]  ;;  %v232_v16 = vld [vmem:[%s1182_s2 + $0x8] sm:$0xff]  ;;  %v238_v21 = vld [vmem:[%s1182_s2 + $0x38] sm:$0xff]  ;;  %s882_s22 = sshra.s32 %s586_s14, 4  ;;  %s883_s22 = int_to_ptr.hbm [resolvable:$true] %s882_s22 }
  0x19   : > { %v768_v8 = vld [vmem:[%s206_s30] sm:$0xff]  ;;  %v771_v9 = vld [vmem:[%s206_s30 + $0x18] sm:$0xff]  ;;  %v770_v10 = vld [vmem:[%s206_s30 + $0x10] sm:$0xff]  ;;  %s884_s23 = scalar_lea.hbm %s883_s22, 8  ;;  %s888_s19 = scalar_lea.hbm %s1183_s3, 16 }
  0x1a   : > { %312 = vmatpush.bf16.msra.mxu0 %v778_v1  ;;  %783 = vmatpush.bf16.msra.mxu3 %v778_v1  ;;  %v769_v11 = vld [vmem:[%s206_s30 + $0x8] sm:$0xff]  ;;  %v233_v23 = vld [vmem:[%s1182_s2 + $0x10] sm:$0xff]  ;;  %v235_v29 = vld [vmem:[%s1182_s2 + $0x20] sm:$0xff]  ;;  %p885_p11 = scmp.ne.s32.totalorder %s883_s22, %s884_s23  ;;  %p889_p0 = scmp.lt.s32.totalorder %s883_s22, %s1183_s3 }
  0x1b   : > { %782 = vmatpush.bf16.msra.mxu1 %v778_v1  ;;  %v236_v30 = vld [vmem:[%s1182_s2 + $0x28] sm:$0xff]  ;;  %v234_v34 = vld [vmem:[%s1182_s2 + $0x18] sm:$0xff]  ;;  %p890_p1 = scmp.lt.s32.totalorder %s888_s19, %s884_s23 }
  0x1c   : > { %p886_p12 = pnand %p885_p11, %p1031_p5 }
  0x1d   : > { %p891_p2 = por %p890_p1, %p889_p0 }
  0x1e   : > { %313 = vmatpush.bf16.msra.mxu0 %v777_v2  ;;  %785 = vmatpush.bf16.msra.mxu3 %v777_v2  ;;  %p887_p13 = pneg %p886_p12 }
  0x1f   : > { %784 = vmatpush.bf16.msra.mxu1 %v777_v2 }
  0x20   : > { %p892_p3 = pnand %p891_p2, %p887_p13 }
  0x22   : > { %314 = vmatpush.bf16.msra.mxu0 %v776_v3  ;;  %787 = vmatpush.bf16.msra.mxu3 %v776_v3 }
  0x23   : > { %786 = vmatpush.bf16.msra.mxu1 %v776_v3 }
  0x26   : > { %315 = vmatpush.bf16.msra.mxu0 %v775_v4  ;;  %789 = vmatpush.bf16.msra.mxu3 %v775_v4 }
  0x27   : > { %788 = vmatpush.bf16.msra.mxu1 %v775_v4 }
  0x2a   : > { %316 = vmatpush.bf16.msra.mxu0 %v774_v5  ;;  %791 = vmatpush.bf16.msra.mxu3 %v774_v5 }
  0x2b   : > { %790 = vmatpush.bf16.msra.mxu1 %v774_v5 }
  0x2e   : > { %317 = vmatpush.bf16.msra.mxu0 %v773_v6  ;;  %793 = vmatpush.bf16.msra.mxu3 %v773_v6 }
  0x2f   : > { %792 = vmatpush.bf16.msra.mxu1 %v773_v6 }
  0x32   : > { %318 = vmatpush.bf16.msra.mxu0 %v772_v7  ;;  %795 = vmatpush.bf16.msra.mxu3 %v772_v7 }
  0x33   : > { %794 = vmatpush.bf16.msra.mxu1 %v772_v7 }
  0x35   : > { %319 = vmatmul.bf16.vlgmr.msra.gmra.mxu0 %v768_v8  ;;  %334 = vmatmul.bf16.vlgmr.msra.gmra.mxu3 %v771_v9 }
  0x36   : > { %329 = vmatmul.bf16.vlgmr.msra.gmra.mxu1 %v770_v10 }
  0x45   : > { %324 = vmatmul.bf16.gmra.mxu0 %v769_v11  ;;  %v496_v11 = vlaneseq }
  0xb2   : > { %v320_v13 = vpop.f32.mrf.mxu0 }
  0xb3   : > { %v1073_v14 = vadd.f32 %v320_v13, %v231_v12  ;;  %v330_v18 = vpop.f32.mrf.mxu1  ;;  %v497_v12 = vand.u32 127, %v496_v11 }
  0xb4   : > { %v331_v32 = vadd.f32 %v330_v18, %v235_v29 }
  0xb5   : > { %340 = vxpose.xlu2.b32.start [1/8] (short) (narrow) %v1073_v14, 8 }
  0xb8   : > { %v335_v15 = vpop.f32.mrf.mxu3 }
  0xb9   : > { %v336_v24 = vadd.f32 %v335_v15, %v237_v20 }
  0xba   : > { %v322_v17 = vpop.f32.mrf.mxu0 }
  0xbb   : > { %v323_v19 = vadd.f32 %v322_v17, %v232_v16  ;;  %v332_v31 = vpop.f32.mrf.mxu1 }
  0xbc   : > { %v333_v33 = vadd.f32 %v332_v31, %v236_v30 }
  0xbd   : > { %341 = vxpose.xlu2.b32.cont [2/8] (short) (narrow) %v323_v19, 8  ;;  %v859_v39 = vpack.i.bf16 %v1073_v14, %v323_v19 }
  0xbe   : > { %v849_v37 = vpack.i.bf16 %v331_v32, %v333_v33 }
  0xc0   : > { %v337_v22 = vpop.f32.mrf.mxu3 }
  0xc1   : > { %v338_v25 = vadd.f32 %v337_v22, %v238_v21 }
  0xc2   : > { %v325_v26 = vpop.f32.mrf.mxu0 }
  0xc3   : > { %v326_v27 = vadd.f32 %v325_v26, %v233_v23  ;;  %v844_v28 = vpack.i.bf16 %v336_v24, %v338_v25 }
  0xc5   : > { %845 = vrot.lane.b32.xlu0 %v844_v28, %s964_s28  ;;  %342 = vxpose.xlu2.b32.cont [3/8] (short) (narrow) %v326_v27, 8 }
  0xca   : > { %v327_v35 = vpop.f32.mrf.mxu0 }
  0xcb   : > { %v328_v36 = vadd.f32 %v327_v35, %v234_v34 }
  0xcd   : > { %850 = vrot.lane.b32.xlu0 %v849_v37, %s964_s28  ;;  %343 = vxpose.xlu2.b32.cont [4/8] (short) (narrow) %v328_v36, 8  ;;  %v854_v38 = vpack.i.bf16 %v326_v27, %v328_v36 }
  0xcf   : > { %855 = vrot.lane.b32.xlu1 %v854_v38, %s964_s28 }
  0xd5   : > { %344 = vxpose.xlu2.b32.cont [5/8] (short) (narrow) %v331_v32, 8 }
  0xd7   : > { %860 = vrot.lane.b32.xlu1 %v859_v39, %s964_s28 }
  0xdd   : > { %345 = vxpose.xlu2.b32.cont [6/8] (short) (narrow) %v333_v33, 8 }
  0xdf   : > { %454 = vrot.lane.b32.xlu1 %v338_v25, %s965_s5 }
  0xe5   : > { %346 = vxpose.xlu2.b32.cont [7/8] (short) (narrow) %v336_v24, 8 }
  0xe7   : > { %452 = vrot.lane.b32.xlu1 %v336_v24, %s965_s5 }
  0xed   : > { %347 = vxpose.xlu2.b32.end [8/8] (short) (narrow) %v338_v25, 8 }
  0xef   : > { %450 = vrot.lane.b32.xlu1 %v333_v33, %s965_s5 }
  0xf7   : > { %448 = vrot.lane.b32.xlu1 %v331_v32, %s965_s5 }
  0xff   : > { %446 = vrot.lane.b32.xlu1 %v328_v36, %s965_s5 }
 0x107   : > { %444 = vrot.lane.b32.xlu1 %v326_v27, %s965_s5  ;;  %v966_v27 = vmov 0.0  }
 0x10f   : > { %442 = vrot.lane.b32.xlu1 %v323_v19, %s965_s5 }
 0x137   : > { %v846_v40 = vpop.permute.xlu0 %845 }
 0x138   : > { %v847_v41 = vunpack.i.l.bf16 %v846_v40  ;;  %v848_v42 = vunpack.i.h.bf16 %v846_v40 }
 0x13a   : > { %416 = vmatpush.msrb.mxu1 %v847_v41 }
 0x13c   : > { %417 = vmatpush.msrb.mxu1 %v848_v42 }
 0x13f   : > { %v851_v43 = vpop.permute.xlu0 %850 }
 0x140   : > { %v852_v44 = vunpack.i.l.bf16 %v851_v43  ;;  %v853_v46 = vunpack.i.h.bf16 %v851_v43 }
 0x141   : > { %v856_v45 = vpop.permute.xlu1 %855 }
 0x142   : > { %418 = vmatpush.msrb.mxu1 %v852_v44  ;;  %v857_v47 = vunpack.i.l.bf16 %v856_v45  ;;  %v858_v48 = vunpack.i.h.bf16 %v856_v45 }
 0x144   : > { %419 = vmatpush.msrb.mxu1 %v853_v46 }
 0x146   : > { %420 = vmatpush.msrb.mxu1 %v857_v47 }
 0x148   : > { %421 = vmatpush.msrb.mxu1 %v858_v48 }
 0x149   : > { %v861_v49 = vpop.permute.xlu1 %860 }
 0x14a   : > { %v862_v50 = vunpack.i.l.bf16 %v861_v49  ;;  %v863_v51 = vunpack.i.h.bf16 %v861_v49 }
 0x14c   : > { %422 = vmatpush.msrb.mxu1 %v862_v50 }
 0x14e   : > { %v356_v52 = vpop.trf.xlu2  ;;  %423 = vmatpush.msrb.mxu1 %v863_v51 }
 0x14f   : > { %748 = vmatmul.msk.f32.vlgmr.msrb.gmra.mxu1 %vm404_vm0, %v356_v52 }
 0x151   : > { %v455_v53 = vpop.permute.xlu1 %454 }
 0x152   : > { %749 = vmatpush.xpose.msk.msra.mxu2 %vm456_vm1, %v455_v53 }
 0x156   : > { %440 = vrot.lane.b32.xlu2 %v1073_v14, %s965_s5 }
 0x159   : > { %v453_v54 = vpop.permute.xlu1 %452 }
 0x15a   : > { %750 = vmatpush.xpose.msk.msra.mxu2 %vm456_vm1, %v453_v54 }
 0x161   : > { %v451_v55 = vpop.permute.xlu1 %450 }
 0x162   : > { %751 = vmatpush.xpose.msk.msra.mxu2 %vm456_vm1, %v451_v55 }
 0x169   : > { %v449_v56 = vpop.permute.xlu1 %448 }
 0x16a   : > { %752 = vmatpush.xpose.msk.msra.mxu2 %vm456_vm1, %v449_v56 }
 0x171   : > { %v447_v57 = vpop.permute.xlu1 %446 }
 0x172   : > { %753 = vmatpush.xpose.msk.msra.mxu2 %vm456_vm1, %v447_v57 }
 0x179   : > { %v445_v58 = vpop.permute.xlu1 %444 }
 0x17a   : > { %754 = vmatpush.xpose.msk.msra.mxu2 %vm456_vm1, %v445_v58 }
 0x181   : > { %v443_v59 = vpop.permute.xlu1 %442 }
 0x182   : > { %755 = vmatpush.xpose.msk.msra.mxu2 %vm456_vm1, %v443_v59 }
 0x1b0   : > { %v441_v60 = vpop.permute.xlu2 %440 }
 0x1b1   : > { %756 = vmatpush.xpose.msk.msra.mxu2 %vm456_vm1, %v441_v60 }
 0x1cc   : > { %v425_v61 = vpop.f32.mrf.mxu1 }
 0x1cd   : > { %v429_v62 = vsel %vm428_vm2, %v425_v61, -inf }
 0x1ce   : > { %430 = vmax.xlane.f32.xlu0 %v429_v62 }
 0x241   : > { %v431_v63 = vpop.xlane.xlu0 %430 }
 0x242   : > { %v432_v0 = vsub.f32 %v425_v61, %v431_v63 }
 0x244   : > { %v433_v1 = vmul.f32 1.442695, %v432_v0 }
 0x246   : > { %864 = vpow2.f32 %v433_v1 }
 0x24c   : > { %v865_v2 = vpop.eup %864 }
 0x24d   : > { %v435_v3 = vsel %vm428_vm2, %v865_v2, 0.0 }
 0x24e   : > { %436 = vadd.xlane.f32.xlu0 %v435_v3 }
 0x2c1   : > { %v437_v4 = vpop.xlane.xlu0 %436 }
 0x2c2   : > { %866 = vrcp.f32 %v437_v4 }
 0x2c8   : > { %v867_v5 = vpop.eup %866 }
 0x2c9   : > { %v439_v6 = vmul.f32 %v867_v5, %v865_v2 }
 0x2cb   : > { %757 = vmatmul.msk.f32.vlgmr.msra.gmra.mxu2 %vm456_vm1, %v439_v6 }
 0x34e   : > { %v493_v7 = vpop.f32.mrf.mxu2 }
 0x34f   : > { %v559_v8 = vsel %vm404_vm0, %v493_v7, 0.0  ;;  %v499_v9 = vsel %vm498_vm3, %v493_v7, -inf }
 0x350   : > { %500 = vmax.xlane.f32.xlu0 %v499_v9  ;;  %v561_v10 = vsel %vm560_vm4, %v559_v8, 0.0 }
 0x351   : > { %563 = vst [vmem:[%s1125_s8] sm:$0xff] %v561_v10 }
 0x3c3   : > { %v501_v13 = vpop.xlane.xlu0 %500 }
 0x3c4   : > { %vm502_vm5 = vcmp.eq.f32.partialorder %v493_v7, %v501_v13 }
 0x3c5   : > { %v503_v14 = vsel %vm502_vm5, %v497_v12, 64 }
 0x3c6   : > { %v504_v15 = vsel %vm498_vm3, %v503_v14, 2147483647 }
 0x3c7   : > { %v506_v16 = vshra.s32 %v504_v15, 16  ;;  %v505_v18 = vand.u32 65535, %v504_v15 }
 0x3c9   : > { %v508_v17 = vcvt.s32.f32 %v506_v16  ;;  %v507_v20 = vcvt.s32.f32 %v505_v18 }
 0x3cb   : > { %509 = vmin.xlane.f32.xlu1 %v508_v17 }
 0x43e   : > { %v510_v19 = vpop.xlane.xlu1 %509 }
 0x43f   : > { %vm511_vm6 = vcmp.eq.f32.partialorder %v508_v17, %v510_v19  ;;  %v516_v22 = vcvt.f32.s32 %v510_v19 }
 0x440   : > { %v512_v21 = vsel %vm511_vm6, %v507_v20, inf }
 0x441   : > { %513 = vmin.xlane.f32.xlu0 %v512_v21  ;;  %v517_v24 = vshll.u32 %v516_v22, 16 }
 0x4b4   : > { %v514_v23 = vpop.xlane.xlu0 %513 }
 0x4b5   : > { %v515_v25 = vcvt.f32.s32 %v514_v23 }
 0x4b7   : > { %v518_v26 = vadd.s32 %v517_v24, %v515_v25 }
 0x4b9   : > { %vm519_vm7 = vcmp.eq.s32.totalorder %v497_v12, %v518_v26 }
 0x4ba   : > { %v758_v28 = vsel %vm519_vm7, 1.0, %v966_v27 }
 0x4bb   : > { %759 = vmatpush.xpose.msk.msrb.mxu3 %vm404_vm0, %v758_v28 }
 0x4be   : > { %760 = vmatmul.msk.f32.vlgmr.msrb.gmra.mxu3 %vm404_vm0, %v493_v7 }
 0x4bf   : > { %895 = shalt.err (!%p892_p3)
}
 0x4c0   : > { %796 = dma.vmem_to_hbm [thread:$0]  (%p1031_p5), %s584_s13, 128, %s586_s14, %s566_s20   ;;  %v548_v30 = vcvt.s32.f32 %v518_v26  ;;  %vm553_vm8 = vcmask 7168   ;;  %vm555_vm9 = vcmask 15360   ;;  %vm557_vm10 = vcmask 48128  }
 0x4c1   : > { %s967_s5 = smov 2   ;;  %s595_s11 = scalar_lea.hbm %s1184_s4, %s763_s9 }
 0x4c2   : > { %s201_s12 = scalar_lea.vmem [#allocation4], %s696_s7  ;;  %s599_s23 = sshll.u32 %s595_s11, 4  ;;  %v554_v31 = vsel %vm553_vm8, %v501_v13, %v548_v30  ;;  %s600_s23 = int_to_ptr.hbm [resolvable:$true] %s599_s23 }
 0x4c3   : > { %s597_s22 = sshll.u32 %s201_s12, 4  ;;  %s571_s13 = scalar_lea.sflag [#allocation5], %s1118_s6  ;;  %s598_s22 = int_to_ptr.vmem [resolvable:$true] %s597_s22 }
 0x4c4   : > { %s910_s14 = sshra.s32 %s600_s23, 4  ;;  %s916_s27 = scalar_lea.hbm %s1184_s4, 16  ;;  %s911_s14 = int_to_ptr.hbm [resolvable:$true] %s910_s14 }
 0x4c5   : > { %s912_s9 = scalar_lea.hbm %s911_s14, 8  ;;  %p917_p9 = scmp.lt.s32.totalorder %s911_s14, %s1184_s4 }
 0x4c6   : > { %p913_p4 = scmp.ne.s32.totalorder %s911_s14, %s912_s9  ;;  %p918_p10 = scmp.lt.s32.totalorder %s916_s27, %s912_s9 }
 0x4c8   : > { %p914_p7 = pnand %p913_p4, %p1031_p5  ;;  %p919_p11 = por %p918_p10, %p917_p9 }
 0x4ca   : > { %p915_p8 = pneg %p914_p7 }
 0x4cc   : > { %p920_p12 = pnand %p919_p11, %p915_p8 }
 0x541   : > { %v545_v29 = vpop.f32.mrf.mxu3 }
 0x542   : > { %550 = vrot.lane.b32.xlu0 %v545_v29, %s967_s5 }
 0x5b4   : > { %v551_v32 = vpop.permute.xlu0 %550 }
 0x5b5   : > { %v556_v33 = vsel %vm555_vm9, %v554_v31, %v551_v32 }
 0x5b6   : > { %v558_v34 = vsel %vm557_vm10, %v556_v33, 0.0 }
 0x5b7   : > { %v562_v35 = vsel %vm560_vm4, %v558_v34, 0.0 }
 0x5b8   : > { %564 = vst [vmem:[%s201_s12] sm:$0xff] %v562_v35 }
 0x5b9   : > { %923 = shalt.err (!%p920_p12)
}
 0x5ba   : > { %797 = dma.vmem_to_hbm [thread:$0]  (%p1031_p5), %s598_s22, 128, %s600_s23, %s571_s13  }
 0x5bb PF: > { %p807_p13 = scmp.ge.s32.totalorder %s962_s18, 2  ;;  %s611_s6 = sand.u32 1, %s950_s15  }
 0x5bc   : > { %s612_s29 = scalar_lea.sflag [#allocation3], %s611_s6 }
 0x5bd   : > { %p801_p0 = pnand %p807_p13, %p1035_p6 }
 0x5bf   : > { %p802_p1 = pneg %p801_p0 }
 0x5c1   : > { %941 = dma.done.wait (%p802_p1), %s612_s29, 128  }
 0x5c2   : > { %943 = vsyncadd (%p802_p1), %s612_s29, 4294967168  ;;  %s622_s30 = scalar_lea.sflag [#allocation5], %s611_s6 }
 0x5c3   : > { %945 = dma.done.wait (%p802_p1), %s622_s30, 128  }
 0x5c4   : > { %947 = vsyncadd (%p802_p1), %s622_s30, 4294967168  ;;  %p18_p5 = scmp.ge.s32.totalorder %s1018_s21, 4   ;;  %s1187_s15 = smov %s954_s16 }
 0x5c5   : > { %s1188_s16 = smov %s958_s17  ;;  %s1189_s17 = smov %s1029_s24 }
 0x5c6   : > { %s1190_s18 = smov %s1018_s21  ;;  %20 = sbr.rel (!%p18_p5) target bundleno = 5 (0x5), region = 84 }
 0x5cb   :  { %628 = vsyncpa [#allocation3], 1 }
 0x5cc   :  { %630 = vsyncpa [#allocation3 + $0x1], 1 }
 0x5cd   :  { %631 = vsyncpa [#allocation5], 1 }
 0x5ce   :  { %633 = vsyncpa [#allocation5 + $0x1], 1 }

</bundles_post_ra>
